<compile_context>
chip_gen: v6e
topology: v6e:2x2x1
jax: 0.10.0
libtpu: 0.0.40
codegen_flags: <defaults>
</compile_context>

<pallas_src>
import functools

import jax
import jax.numpy as jnp
from jax.experimental import pallas as pl
from jax.experimental.pallas import tpu as pltpu


_VMEM_LIMIT_BYTES = 48 * 1024 * 1024   # < 64 MiB physical on v7x, < 128 MiB on v5e/v6e
_BLOCK_BYTES_BUDGET = 4 * 1024 * 1024  # per-block budget (x4 when in+out double-buffered)


# --------------------------------------------------------------------------
# Kernels
# --------------------------------------------------------------------------
def _permute_tile_kernel(x_ref, o_ref, *, swap_minor):
    y = x_ref[...]
    if swap_minor:
        y = jnp.swapaxes(y, -1, -2)
    # All non-fused leading block dims are size 1 and the fused leading dims
    # keep their relative order between input and output, so this reshape only
    # relabels size-1 axes (layout no-op: last two dims untouched).
    o_ref[...] = y.reshape(o_ref.shape)


def _general_kernel(x_ref, o_ref, *, perm):
    # TODO(synk): truly general permutations (last two input dims not mapping
    # onto the last two output dims) use Mosaic's generic transpose of a block
    # holding all minor-involved dims; huge planes may exceed VMEM here.  The
    # discriminator only uses Permute(0, 2, 1), which takes the fast path.
    o_ref[...] = jnp.transpose(x_ref[...], perm)


# --------------------------------------------------------------------------
# Helpers
# --------------------------------------------------------------------------
def _cost(x):
    nbytes = int(x.size) * jnp.dtype(x.dtype).itemsize
    return pl.CostEstimate(flops=0, transcendentals=0, bytes_accessed=2 * nbytes)


def _merge_runs(shape, perm):
    """Merge output-adjacent dims that are also input-adjacent (metadata-only)."""
    runs = []
    cur = [perm[0]]
    for p in perm[1:]:
        if p == cur[-1] + 1:
            cur.append(p)
        else:
            runs.append(cur)
            cur = [p]
    runs.append(cur)                      # runs in OUTPUT order
    order = sorted(range(len(runs)), key=lambda r: runs[r][0])  # input order
    new_in_shape = []
    run_to_new_dim = {}
    for new_d, r in enumerate(order):
        size = 1
        for d in runs[r]:
            size *= shape[d]
        new_in_shape.append(size)
        run_to_new_dim[r] = new_d
    new_perm = tuple(run_to_new_dim[r] for r in range(len(runs)))
    return tuple(new_in_shape), new_perm


def _pick_tile(size, align, cap):
    """Full dim if small; else the largest multiple of `align` that divides `size`."""
    if size <= cap:
        return size
    t = (cap // align) * align
    while t >= align:
        if size % t == 0:
            return t
        t -= align
    return size                           # no aligned divisor -> full dim


# --------------------------------------------------------------------------
# Fast path: the last two input dims map onto the last two output dims
# (possibly swapped); all leading dims are permuted purely via index_maps.
# --------------------------------------------------------------------------
def _fast_path(x, perm, out_sds):
    nd = x.ndim
    shape = x.shape
    itemsize = jnp.dtype(x.dtype).itemsize
    swap_minor = perm[-1] == nd - 2
    nlead = nd - 2
    r_in, c_in = shape[-2], shape[-1]

    # Minor tiles.  Lane-critical dims (input last dim; and input dim nd-2,
    # which becomes the OUTPUT lane dim when swapped) use 128-aligned tiles so
    # both loads and stores stay lane-dense and unmasked.
    if swap_minor:
        tr = _pick_tile(r_in, 128, 1024)
        tc = _pick_tile(c_in, 128, 512)
    else:
        tr = _pick_tile(r_in, 8, 512)
        tc = _pick_tile(c_in, 128, 1024)

    # Fuse innermost leading output dims (full extent) into the block while
    # their input dims keep relative order and the block stays under budget.
    block_bytes = tr * tc * itemsize
    fused = set()        # output positions
    fused_in = set()     # input dims
    min_fused_in = nd
    for k in range(nlead - 1, -1, -1):
        d = perm[k]
        if d >= min_fused_in:
            break
        nb = block_bytes * shape[d]
        if nb > _BLOCK_BYTES_BUDGET:
            break
        fused.add(k)
        fused_in.add(d)
        min_fused_in = d
        block_bytes = nb

    g_positions = tuple(k for k in range(nlead) if k not in fused)
    G = len(g_positions)
    grid = tuple(shape[perm[k]] for k in g_positions) + (r_in // tr, c_in // tc)
    gax = {perm[k]: i for i, k in enumerate(g_positions)}   # input dim -> grid axis

    in_block = tuple(
        shape[d] if d in fused_in
        else (tr if d == nd - 2 else (tc if d == nd - 1 else 1))
        for d in range(nd))

    out_block = []
    for k in range(nd):
        d = perm[k]
        if k in fused:
            out_block.append(shape[d])
        elif k == nd - 2:
            out_block.append(tc if swap_minor else tr)
        elif k == nd - 1:
            out_block.append(tr if swap_minor else tc)
        else:
            out_block.append(1)
    out_block = tuple(out_block)

    def in_index_map(*idx):
        res = []
        for d in range(nd):
            if d == nd - 2:
                res.append(idx[G])
            elif d == nd - 1:
                res.append(idx[G + 1])
            elif d in fused_in:
                res.append(0)
            else:
                res.append(idx[gax[d]])
        return tuple(res)

    def out_index_map(*idx):
        res = []
        for k in range(nd):
            d = perm[k]
            if k == nd - 2:
                res.append(idx[G + 1] if swap_minor else idx[G])
            elif k == nd - 1:
                res.append(idx[G] if swap_minor else idx[G + 1])
            elif k in fused:
                res.append(0)
            else:
                res.append(idx[gax[d]])
        return tuple(res)

    return pl.pallas_call(
        functools.partial(_permute_tile_kernel, swap_minor=swap_minor),
        out_shape=out_sds,
        grid=grid,
        in_specs=[pl.BlockSpec(in_block, in_index_map)],
        out_specs=pl.BlockSpec(out_block, out_index_map),
        compiler_params=pltpu.CompilerParams(
            dimension_semantics=("parallel",) * len(grid),
            vmem_limit_bytes=_VMEM_LIMIT_BYTES),
        cost_estimate=_cost(x),
    )(x)


# --------------------------------------------------------------------------
# General fallback: grid over every output dim not involved with either
# minor pair; all minor-involved dims are blocked at full extent so both the
# input and output blocks keep valid (8, 128)-compatible trailing dims.
# --------------------------------------------------------------------------
def _general_path(x, perm, out_sds):
    nd = x.ndim
    shape = x.shape
    dims_full = {nd - 2, nd - 1, perm[-2], perm[-1]}
    g_positions = tuple(k for k in range(nd) if perm[k] not in dims_full)
    gax = {perm[k]: i for i, k in enumerate(g_positions)}
    grid = tuple(shape[perm[k]] for k in g_positions)
    if not grid:
        grid = (1,)

    in_block = tuple(shape[d] if d in dims_full else 1 for d in range(nd))
    out_block = tuple(shape[perm[k]] if perm[k] in dims_full else 1 for k in range(nd))

    def in_index_map(*idx):
        return tuple(0 if d in dims_full else idx[gax[d]] for d in range(nd))

    def out_index_map(*idx):
        return tuple(0 if perm[k] in dims_full else idx[gax[perm[k]]]
                     for k in range(nd))

    return pl.pallas_call(
        functools.partial(_general_kernel, perm=perm),
        out_shape=out_sds,
        grid=grid,
        in_specs=[pl.BlockSpec(in_block, in_index_map)],
        out_specs=pl.BlockSpec(out_block, out_index_map),
        compiler_params=pltpu.CompilerParams(
            dimension_semantics=("arbitrary",) * len(grid),
            vmem_limit_bytes=_VMEM_LIMIT_BYTES),
        cost_estimate=_cost(x),
    )(x)


# --------------------------------------------------------------------------
# Wrapper
# --------------------------------------------------------------------------
@functools.partial(jax.jit, static_argnums=1)
def pallas_permute(x, perm):
    """Pallas equivalent of PyTorch `x.permute(*perm)`."""
    ndim = x.ndim
    perm = tuple(int(p) + (ndim if int(p) < 0 else 0) for p in perm)
    if sorted(perm) != list(range(ndim)):
        raise ValueError(f"invalid permutation {perm} for rank-{ndim} input")
    out_shape = tuple(x.shape[p] for p in perm)

    # Identity permutation: pure metadata, no data movement at all.
    if perm == tuple(range(ndim)):
        return x

    # Merge runs of dims that stay adjacent in both input and output
    # (metadata-only reshape) -> smaller rank, bigger contiguous blocks.
    m_shape, m_perm = _merge_runs(x.shape, perm)
    xm = x.reshape(m_shape)
    nd = len(m_shape)
    m_out_shape = tuple(m_shape[p] for p in m_perm)
    out_sds = jax.ShapeDtypeStruct(m_out_shape, x.dtype)

    if nd >= 2 and set(m_perm[-2:]) == {nd - 2, nd - 1}:
        ym = _fast_path(xm, m_perm, out_sds)
    else:
        ym = _general_path(xm, m_perm, out_sds)

    return ym.reshape(out_shape)


class Permute:
    """Mirror of the PyTorch module: forward(input) = input.permute(*perm)."""

    def __init__(self, *perm):
        self.perm = tuple(perm)

    def __call__(self, x):
        return pallas_permute(x, self.perm)


# --------------------------------------------------------------------------
# Demo / self-check
# --------------------------------------------------------------------------
if __name__ == "__main__":
    key = jax.random.PRNGKey(0)
    k1, k2, k3 = jax.random.split(key, 3)

    # Case 1: discriminator-style Permute(0, 2, 1): (N, S, F) -> (N, F, S).
    # Output last dim is 128 -> lane-dense unmasked stores; leading dim fused.
    x3 = jax.random.normal(k1, (2, 128, 8), jnp.float32)
    y3 = Permute(0, 2, 1)(x3)

    # Case 2: rank-4 leading shuffle + minor swap:
    # (2, 4, 16, 128) --perm(1,0,3,2)--> (4, 2, 128, 16).
    x4 = jax.random.normal(k2, (2, 4, 16, 128), jnp.float32)
    y4 = Permute(1, 0, 3, 2)(x4)

    # Case 3: exercises the run-merging path ((0,1) merge) + minor swap:
    # (2, 4, 16, 128) --perm(0,1,3,2)--> (2, 4, 128, 16).
    x5 = jax.random.normal(k3, (2, 4, 16, 128), jnp.float32)
    y5 = Permute(0, 1, 3, 2)(x5)

    # Case 4: identity permutation -> no-op fast exit.
    y6 = Permute(0, 1, 2)(x3)

    jax.block_until_ready((y3, y4, y5, y6))

    assert y3.shape == (2, 8, 128)
    assert y4.shape == (4, 2, 128, 16)
    assert y5.shape == (2, 4, 128, 16)
    assert jnp.array_equal(y3, jnp.transpose(x3, (0, 2, 1)))
    assert jnp.array_equal(y4, jnp.transpose(x4, (1, 0, 3, 2)))
    assert jnp.array_equal(y5, jnp.transpose(x5, (0, 1, 3, 2)))
    assert jnp.array_equal(y6, x3)
    assert jnp.all(jnp.isfinite(y3)) and jnp.all(jnp.isfinite(y4))
    print("KERNEL_OK")
</pallas_src>

<mosaic_0001>
module attributes {stable_mosaic.version = 11 : i64} {
  func.func @_permute_tile_kernel(%arg0: i32, %arg1: i32, %arg2: memref<2x128x8xf32, #tpu.memory_space<vmem>>, %arg3: memref<2x8x128xf32, #tpu.memory_space<vmem>>) attributes {dimension_semantics = [#tpu.dimension_semantics<parallel>, #tpu.dimension_semantics<parallel>], iteration_bounds = array<i64: 1, 1>, scalar_prefetch = 0 : i64, scratch_operands = 0 : i64, tpu.core_type = #tpu.core_type<tc>, window_params = [{transform_indices = @transform_0, window_bounds = array<i64: 2, 128, 8>}, {transform_indices = @transform_1, window_bounds = array<i64: 2, 8, 128>}]} {
    %c0 = arith.constant 0 : index
    %c0_0 = arith.constant 0 : index
    %c0_1 = arith.constant 0 : index
    %0 = vector.load %arg2[%c0, %c0_0, %c0_1] : memref<2x128x8xf32, #tpu.memory_space<vmem>>, vector<2x128x8xf32>
    %1 = tpu.transpose %0, [0, 2, 1] : vector<2x128x8xf32> -> vector<2x8x128xf32>
    %c0_2 = arith.constant 0 : index
    %c0_3 = arith.constant 0 : index
    %c0_4 = arith.constant 0 : index
    %2 = vector.load %arg3[%c0_2, %c0_3, %c0_4] : memref<2x8x128xf32, #tpu.memory_space<vmem>>, vector<2x8x128xf32>
    tpu.vector_store %arg3[%c0_2, %c0_3, %c0_4], %1 {strides = array<i32>} : memref<2x8x128xf32, #tpu.memory_space<vmem>>, vector<2x8x128xf32>,
    return
  }
  func.func @transform_0(%arg0: i32, %arg1: i32) -> (i32, i32, i32) {
    %c0_i32 = arith.constant 0 : i32
    %c0_i32_0 = arith.constant 0 : i32
    return %c0_i32, %arg0, %arg1 : i32, i32, i32
  }
  func.func @transform_1(%arg0: i32, %arg1: i32) -> (i32, i32, i32) {
    %c0_i32 = arith.constant 0 : i32
    %c0_i32_0 = arith.constant 0 : i32
    return %c0_i32, %arg1, %arg0 : i32, i32, i32
  }
}

</mosaic_0001>

<bundles_post_ra>
// kernel: pallas_permute.1
= control target key start
LH: loop header
LB: loop body
LE: loop exit
PB: predicated region body
PF: predicated region fallthrough
CT: control target
= control target key end

     0   :  { %s260_s0 = inlined_call_operand.vmem [shape: f32[2,128,8], index: 0, kind: input, shape index: {}]   ;;  %s261_s1 = inlined_call_operand.hbm [shape: f32[2,8,128], index: 1, kind: output, shape index: {}]  }
   0x1   :  { %v25_v0 = vld [vmem:[%s260_s0 + $0x80] sm:$0xff]  ;;  %v26_v2 = vld [vmem:[%s260_s0 + $0x88] sm:$0xff]  ;;  %v27_v4 = vld [vmem:[%s260_s0 + $0x90] sm:$0xff] }
   0x2   :  { %v9_v1 = vld [vmem:[%s260_s0] sm:$0xff]  ;;  %73 = vxpose.xlu1.b32.start [1/16] (narrow) %v25_v0, 8  ;;  %v10_v3 = vld [vmem:[%s260_s0 + $0x8] sm:$0xff]  ;;  %v11_v5 = vld [vmem:[%s260_s0 + $0x10] sm:$0xff] }
   0x3   :  { %41 = vxpose.xlu0.b32.start [1/16] (narrow) %v9_v1, 8  ;;  %v28_v6 = vld [vmem:[%s260_s0 + $0x98] sm:$0xff] }
   0x4   :  { %v12_v7 = vld [vmem:[%s260_s0 + $0x18] sm:$0xff] }
   0x6   :  { %74 = vxpose.xlu1.b32.cont [2/16] (narrow) %v26_v2, 8 }
   0x7   :  { %42 = vxpose.xlu0.b32.cont [2/16] (narrow) %v10_v3, 8 }
   0xa   :  { %75 = vxpose.xlu1.b32.cont [3/16] (narrow) %v27_v4, 8 }
   0xb   :  { %43 = vxpose.xlu0.b32.cont [3/16] (narrow) %v11_v5, 8 }
   0xc   :  { %6 = vsyncpa [#allocation3], 0  ;;  %v29_v8 = vld [vmem:[%s260_s0 + $0xa0] sm:$0xff]  ;;  %v30_v10 = vld [vmem:[%s260_s0 + $0xa8] sm:$0xff]  ;;  %s148_s12 = smov [#allocation2]  }
   0xd   :  { %v13_v9 = vld [vmem:[%s260_s0 + $0x20] sm:$0xff]  ;;  %v14_v11 = vld [vmem:[%s260_s0 + $0x28] sm:$0xff]  ;;  %v31_v12 = vld [vmem:[%s260_s0 + $0xb0] sm:$0xff]  ;;  %s112_s13 = sshll.u32 %s148_s12, 4  ;;  %s113_s13 = int_to_ptr.vmem [resolvable:$true] %s112_s13 }
   0xe   :  { %76 = vxpose.xlu1.b32.cont [4/16] (narrow) %v28_v6, 8  ;;  %v15_v13 = vld [vmem:[%s260_s0 + $0x30] sm:$0xff]  ;;  %v32_v14 = vld [vmem:[%s260_s0 + $0xb8] sm:$0xff]  ;;  %v33_v16 = vld [vmem:[%s260_s0 + $0xc0] sm:$0xff]  ;;  %s126_s14 = scalar_lea.vmem %s113_s13, 256  ;;  %p131_p1 = scmp.lt.s32.totalorder %s113_s13, %s113_s13 }
   0xf   :  { %44 = vxpose.xlu0.b32.cont [4/16] (narrow) %v12_v7, 8  ;;  %v16_v15 = vld [vmem:[%s260_s0 + $0x38] sm:$0xff]  ;;  %v17_v17 = vld [vmem:[%s260_s0 + $0x40] sm:$0xff]  ;;  %v34_v18 = vld [vmem:[%s260_s0 + $0xc8] sm:$0xff]  ;;  %p127_p0 = scmp.ne.s32.totalorder %s113_s13, %s126_s14  ;;  %p132_p2 = scmp.lt.s32.totalorder %s126_s14, %s126_s14 }
  0x10   :  { %v18_v19 = vld [vmem:[%s260_s0 + $0x48] sm:$0xff]  ;;  %v35_v20 = vld [vmem:[%s260_s0 + $0xd0] sm:$0xff]  ;;  %v36_v22 = vld [vmem:[%s260_s0 + $0xd8] sm:$0xff] }
  0x11   :  { %v19_v21 = vld [vmem:[%s260_s0 + $0x50] sm:$0xff]  ;;  %v20_v23 = vld [vmem:[%s260_s0 + $0x58] sm:$0xff]  ;;  %v37_v24 = vld [vmem:[%s260_s0 + $0xe0] sm:$0xff]  ;;  %p133_p3 = por %p132_p2, %p131_p1 }
  0x12   :  { %77 = vxpose.xlu1.b32.cont [5/16] (narrow) %v29_v8, 8  ;;  %v21_v25 = vld [vmem:[%s260_s0 + $0x60] sm:$0xff]  ;;  %v38_v26 = vld [vmem:[%s260_s0 + $0xe8] sm:$0xff]  ;;  %v39_v28 = vld [vmem:[%s260_s0 + $0xf0] sm:$0xff] }
  0x13   :  { %45 = vxpose.xlu0.b32.cont [5/16] (narrow) %v13_v9, 8  ;;  %v22_v27 = vld [vmem:[%s260_s0 + $0x68] sm:$0xff]  ;;  %v23_v29 = vld [vmem:[%s260_s0 + $0x70] sm:$0xff]  ;;  %v40_v30 = vld [vmem:[%s260_s0 + $0xf8] sm:$0xff]  ;;  %p134_p4 = pnand %p133_p3, %p127_p0 }
  0x14   :  { %v24_v31 = vld [vmem:[%s260_s0 + $0x78] sm:$0xff] }
  0x16   :  { %78 = vxpose.xlu1.b32.cont [6/16] (narrow) %v30_v10, 8 }
  0x17   :  { %46 = vxpose.xlu0.b32.cont [6/16] (narrow) %v14_v11, 8 }
  0x1a   :  { %79 = vxpose.xlu1.b32.cont [7/16] (narrow) %v31_v12, 8 }
  0x1b   :  { %47 = vxpose.xlu0.b32.cont [7/16] (narrow) %v15_v13, 8 }
  0x1e   :  { %80 = vxpose.xlu1.b32.cont [8/16] (narrow) %v32_v14, 8 }
  0x1f   :  { %48 = vxpose.xlu0.b32.cont [8/16] (narrow) %v16_v15, 8 }
  0x22   :  { %81 = vxpose.xlu1.b32.cont [9/16] (narrow) %v33_v16, 8 }
  0x23   :  { %49 = vxpose.xlu0.b32.cont [9/16] (narrow) %v17_v17, 8 }
  0x26   :  { %82 = vxpose.xlu1.b32.cont [10/16] (narrow) %v34_v18, 8 }
  0x27   :  { %50 = vxpose.xlu0.b32.cont [10/16] (narrow) %v18_v19, 8 }
  0x2a   :  { %83 = vxpose.xlu1.b32.cont [11/16] (narrow) %v35_v20, 8 }
  0x2b   :  { %51 = vxpose.xlu0.b32.cont [11/16] (narrow) %v19_v21, 8 }
  0x2e   :  { %84 = vxpose.xlu1.b32.cont [12/16] (narrow) %v36_v22, 8 }
  0x2f   :  { %52 = vxpose.xlu0.b32.cont [12/16] (narrow) %v20_v23, 8 }
  0x32   :  { %85 = vxpose.xlu1.b32.cont [13/16] (narrow) %v37_v24, 8 }
  0x33   :  { %53 = vxpose.xlu0.b32.cont [13/16] (narrow) %v21_v25, 8 }
  0x36   :  { %86 = vxpose.xlu1.b32.cont [14/16] (narrow) %v38_v26, 8 }
  0x37   :  { %54 = vxpose.xlu0.b32.cont [14/16] (narrow) %v22_v27, 8 }
  0x3a   :  { %87 = vxpose.xlu1.b32.cont [15/16] (narrow) %v39_v28, 8 }
  0x3b   :  { %55 = vxpose.xlu0.b32.cont [15/16] (narrow) %v23_v29, 8 }
  0x3e   :  { %88 = vxpose.xlu1.b32.end [16/16] (narrow) %v40_v30, 8 }
  0x3f   :  { %56 = vxpose.xlu0.b32.end [16/16] (narrow) %v24_v31, 8 }
  0x7e   :  { %v89_v32 = vpop.trf.xlu1 }
  0x7f   :  { %v57_v33 = vpop.trf.xlu0  ;;  %106 = vst [vmem:[#allocation2 + $0x8] sm:$0xff] %v89_v32 }
  0x80   :  { %105 = vst [vmem:[#allocation2] sm:$0xff] %v57_v33 }
  0x81   :  { %137 = shalt.err (!%p134_p4)
}
  0x82   :  { %s149_s15 = smov 128   ;;  %s150_s16 = smov 8  }
  0x83   :  { %118 = dma.vmem_to_hbm [thread:$0]  %s113_s13, 256, %s261_s1, [#allocation3], %s149_s15, %s149_s15, %s150_s16  }
  0x84   :  { %146 = dma.done.wait [#allocation3], 256  }
  0x85   :  { %147 = vsyncadd [#allocation3], 4294967040 }
  0x86   :  { %122 = vsyncpa [#allocation3], 1 }

</bundles_post_ra>
